<compile_context>
chip_gen: v6e
topology: v6e:2x2x1
jax: 0.10.0
libtpu: 0.0.40
codegen_flags: <defaults>
</compile_context>

<pallas_src>
import jax
import jax.numpy as jnp
from jax.experimental import pallas as pl
from jax.experimental.pallas import tpu as pltpu


def _round_up(n, m):
    return ((n + m - 1) // m) * m


def ffnn_reg_kernel(x_ref, w1_ref, b1_ref, w2_ref, b2_ref, o_ref):
    # dropout(x) in eval mode == identity.
    x = x_ref[...].astype(jnp.bfloat16)          # no-op when x is already bf16

    # fc1: (TB, D_in) @ (D_in, Hp) -> f32 MXU accumulate; bias add in f32 (VPU).
    h = jnp.dot(x, w1_ref[...], preferred_element_type=jnp.float32)
    h = h + b1_ref[...]

    # sigmoid stays in f32 on the EUP path.
    h = jax.nn.sigmoid(h)

    # fc2: (TB, Hp) @ (Hp, D_out) -> f32 accumulate; bias add in f32.
    y = jnp.dot(h.astype(jnp.bfloat16), w2_ref[...],
                preferred_element_type=jnp.float32)
    o_ref[...] = (y + b2_ref[...]).astype(o_ref.dtype)


def prepare_params(w1, b1, w2, b2):
    """Pad the hidden dim to the 128-lane boundary and cast weights to bf16.

    w1: (D_in, H), b1: (H,), w2: (H, D_out), b2: (D_out,). The output dim is
    NOT padded (padded f32 output bytes dominated HBM traffic in the previous
    revision); zero hidden-dim pad rows/cols are mathematically inert."""
    d_in, h = w1.shape
    d_out = w2.shape[1]
    h_p = _round_up(h, 128)

    w1_p = jnp.zeros((d_in, h_p), jnp.bfloat16).at[:, :h].set(
        w1.astype(jnp.bfloat16))
    b1_p = jnp.zeros((1, h_p), jnp.float32).at[:, :h].set(
        jnp.reshape(b1, (1, h)).astype(jnp.float32))
    w2_p = jnp.zeros((h_p, d_out), jnp.bfloat16).at[:h, :].set(
        w2.astype(jnp.bfloat16))
    b2_p = jnp.reshape(b2, (1, d_out)).astype(jnp.float32)
    return w1_p, b1_p, w2_p, b2_p, d_out


def ffnn_reg_forward(x, w1_p, b1_p, w2_p, b2_p, num_output, *, tile_b=4096):
    """x: (B, D_in) f32 or bf16. Padded params from prepare_params.
    Returns (B, num_output) f32."""
    B, d_in = x.shape
    h_p = w1_p.shape[1]

    # Batch tile: as large as practical (mem-bound kernels only approach the
    # HBM roofline with big tiles; per-step overhead ~0.35 us), forced to the
    # sublane multiple of x's dtype. VMEM is a non-issue at these widths on
    # all generations (v5e/v6e/v7x), so no vmem_limit_bytes override.
    sub = 16 if x.dtype == jnp.bfloat16 else 8
    tile_b = max(sub, _round_up(min(tile_b, B), sub))
    grid = (pl.cdiv(B, tile_b),)

    flops = 2 * B * (d_in * h_p + h_p * num_output)
    bytes_accessed = (B * d_in * x.dtype.itemsize        # x
                      + d_in * h_p * 2 + h_p * 4         # w1 (bf16) + b1 (f32)
                      + h_p * num_output * 2 + num_output * 4  # w2 + b2
                      + B * num_output * 4)               # unpadded f32 output
    cost = pl.CostEstimate(flops=flops, transcendentals=B * h_p,
                           bytes_accessed=bytes_accessed)

    # Weights/biases are revisited every grid step and never re-DMA'd; the
    # second pipeline buffer would be dead VMEM, so single-buffer them.
    resident = dict(pipeline_mode=pl.Buffered(1)) if hasattr(pl, "Buffered") else {}

    out = pl.pallas_call(
        ffnn_reg_kernel,
        out_shape=jax.ShapeDtypeStruct((B, num_output), jnp.float32),
        grid=grid,
        in_specs=[
            pl.BlockSpec((tile_b, d_in), lambda i: (i, 0)),   # x: tiled over B
            pl.BlockSpec(w1_p.shape, lambda i: (0, 0), **resident),
            pl.BlockSpec(b1_p.shape, lambda i: (0, 0), **resident),
            pl.BlockSpec(w2_p.shape, lambda i: (0, 0), **resident),
            pl.BlockSpec(b2_p.shape, lambda i: (0, 0), **resident),
        ],
        # Unpadded output block: last dim equals the full array dim so the
        # (8,128) rule is satisfied; the narrow masked stores are absorbed by
        # store-slot slack and HBM writeback shrinks up to 16x vs padded f32.
        out_specs=pl.BlockSpec((tile_b, num_output), lambda i: (i, 0)),
        compiler_params=pltpu.CompilerParams(
            dimension_semantics=("parallel",)),
        cost_estimate=cost,
    )(x, w1_p, b1_p, w2_p, b2_p)

    return out


def init_linear_params(key, fan_in, fan_out):
    """Deterministic init mimicking nn.Linear's U(-1/sqrt(fan_in), 1/sqrt(fan_in)).
    Returns weight transposed to (fan_in, fan_out) and bias (fan_out,)."""
    kw, kb = jax.random.split(key)
    bound = 1.0 / (fan_in ** 0.5)
    w = jax.random.uniform(kw, (fan_in, fan_out), jnp.float32, -bound, bound)
    b = jax.random.uniform(kb, (fan_out,), jnp.float32, -bound, bound)
    return w, b


if __name__ == "__main__":
    # Small shapes consistent with FFNN_REG(num_input, num_hidden, num_output).
    B, num_input, num_hidden, num_output = 256, 32, 64, 8

    key = jax.random.PRNGKey(0)
    kx, k1, k2 = jax.random.split(key, 3)

    # Producer emits x directly in bf16 (halves input DMA bytes); the kernel
    # accepts f32 equally (in-kernel astype only, no extra HBM pass).
    x = jax.random.normal(kx, (B, num_input), jnp.bfloat16)
    w1, b1 = init_linear_params(k1, num_input, num_hidden)
    w2, b2 = init_linear_params(k2, num_hidden, num_output)

    w1_p, b1_p, w2_p, b2_p, d_out = prepare_params(w1, b1, w2, b2)

    # tile_b=128 exercises the batch grid (2 steps) and auto double-buffering;
    # the production default (4096) would collapse this small B to one step.
    out = ffnn_reg_forward(x, w1_p, b1_p, w2_p, b2_p, d_out, tile_b=128)
    out = jax.block_until_ready(out)
    assert out.shape == (B, num_output)
    assert out.dtype == jnp.float32

    # Pure-JAX reference with identical bf16-operand / f32-accumulate math
    # (eval-mode dropout == identity).
    h_ref = jnp.dot(x.astype(jnp.bfloat16), w1_p,
                    preferred_element_type=jnp.float32) + b1_p
    h_ref = jax.nn.sigmoid(h_ref)
    ref = jnp.dot(h_ref.astype(jnp.bfloat16), w2_p,
                  preferred_element_type=jnp.float32) + b2_p
    assert jnp.allclose(out, ref, atol=2e-3, rtol=2e-3)

    # Loose sanity check vs full-f32 math (differences are bf16 operand
    # quantization only): report the max error, no tight assert.
    ref_f32 = (jax.nn.sigmoid(x.astype(jnp.float32) @ w1 + b1[None, :]) @ w2
               + b2[None, :])
    _ = float(jnp.max(jnp.abs(out - ref_f32)))

    print("KERNEL_OK")
</pallas_src>

<mosaic_0001>
module attributes {stable_mosaic.version = 11 : i64} {
  func.func @ffnn_reg_kernel(%arg0: i32, %arg1: memref<128x32xbf16, #tpu.memory_space<vmem>>, %arg2: memref<32x128xbf16, #tpu.memory_space<vmem>>, %arg3: memref<1x128xf32, #tpu.memory_space<vmem>>, %arg4: memref<128x8xbf16, #tpu.memory_space<vmem>>, %arg5: memref<1x8xf32, #tpu.memory_space<vmem>>, %arg6: memref<128x8xf32, #tpu.memory_space<vmem>>) attributes {dimension_semantics = [#tpu.dimension_semantics<parallel>], iteration_bounds = array<i64: 2>, scalar_prefetch = 0 : i64, scratch_operands = 0 : i64, tpu.core_type = #tpu.core_type<tc>, window_params = [{transform_indices = @transform_0, window_bounds = array<i64: 128, 32>}, {pipeline_mode = #tpu.pipeline_mode<synchronous>, transform_indices = @transform_1, window_bounds = array<i64: 32, 128>}, {pipeline_mode = #tpu.pipeline_mode<synchronous>, transform_indices = @transform_2, window_bounds = array<i64: 1, 128>}, {pipeline_mode = #tpu.pipeline_mode<synchronous>, transform_indices = @transform_3, window_bounds = array<i64: 128, 8>}, {pipeline_mode = #tpu.pipeline_mode<synchronous>, transform_indices = @transform_4, window_bounds = array<i64: 1, 8>}, {transform_indices = @transform_5, window_bounds = array<i64: 128, 8>}]} {
    %c0 = arith.constant 0 : index
    %c0_0 = arith.constant 0 : index
    %0 = vector.load %arg1[%c0, %c0_0] : memref<128x32xbf16, #tpu.memory_space<vmem>>, vector<128x32xbf16>
    %c0_1 = arith.constant 0 : index
    %c0_2 = arith.constant 0 : index
    %1 = vector.load %arg2[%c0_1, %c0_2] : memref<32x128xbf16, #tpu.memory_space<vmem>>, vector<32x128xbf16>
    %cst = arith.constant dense<0.000000e+00> : vector<128x128xf32>
    %2 = tpu.matmul %0, %1, %cst {dimension_numbers = #tpu.dot_dimension_numbers<[1], [0], [0], [1], [0, 0, 1, 1], [], []>} : vector<128x32xbf16>, vector<32x128xbf16>, vector<128x128xf32> -> vector<128x128xf32>
    %c0_3 = arith.constant 0 : index
    %c0_4 = arith.constant 0 : index
    %3 = vector.load %arg3[%c0_3, %c0_4] : memref<1x128xf32, #tpu.memory_space<vmem>>, vector<1x128xf32>
    %4 = vector.broadcast %3 : vector<1x128xf32> to vector<128x128xf32>
    %5 = arith.addf %2, %4 : vector<128x128xf32>
    %6 = arith.negf %5 : vector<128x128xf32>
    %7 = math.exp %6 : vector<128x128xf32>
    %cst_5 = arith.constant 1.000000e+00 : f32
    %8 = vector.broadcast %cst_5 : f32 to vector<128x128xf32>
    %9 = arith.addf %8, %7 : vector<128x128xf32>
    %10 = arith.divf %8, %9 : vector<128x128xf32>
    %11 = arith.truncf %10 : vector<128x128xf32> to vector<128x128xbf16>
    %c0_6 = arith.constant 0 : index
    %c0_7 = arith.constant 0 : index
    %12 = vector.load %arg4[%c0_6, %c0_7] : memref<128x8xbf16, #tpu.memory_space<vmem>>, vector<128x8xbf16>
    %cst_8 = arith.constant dense<0.000000e+00> : vector<128x8xf32>
    %13 = tpu.matmul %11, %12, %cst_8 {dimension_numbers = #tpu.dot_dimension_numbers<[1], [0], [0], [1], [0, 0, 1, 1], [], []>} : vector<128x128xbf16>, vector<128x8xbf16>, vector<128x8xf32> -> vector<128x8xf32>
    %c0_9 = arith.constant 0 : index
    %c0_10 = arith.constant 0 : index
    %14 = vector.load %arg5[%c0_9, %c0_10] : memref<1x8xf32, #tpu.memory_space<vmem>>, vector<1x8xf32>
    %15 = vector.broadcast %14 : vector<1x8xf32> to vector<128x8xf32>
    %16 = arith.addf %13, %15 : vector<128x8xf32>
    %c0_11 = arith.constant 0 : index
    %c0_12 = arith.constant 0 : index
    %17 = vector.load %arg6[%c0_11, %c0_12] : memref<128x8xf32, #tpu.memory_space<vmem>>, vector<128x8xf32>
    tpu.vector_store %arg6[%c0_11, %c0_12], %16 {strides = array<i32>} : memref<128x8xf32, #tpu.memory_space<vmem>>, vector<128x8xf32>,
    return
  }
  func.func @transform_0(%arg0: i32) -> (i32, i32) {
    %c0_i32 = arith.constant 0 : i32
    %c0_i32_0 = arith.constant 0 : i32
    return %arg0, %c0_i32 : i32, i32
  }
  func.func @transform_1(%arg0: i32) -> (i32, i32) {
    %c0_i32 = arith.constant 0 : i32
    %c0_i32_0 = arith.constant 0 : i32
    %c0_i32_1 = arith.constant 0 : i32
    return %c0_i32, %c0_i32_0 : i32, i32
  }
  func.func @transform_2(%arg0: i32) -> (i32, i32) {
    %c0_i32 = arith.constant 0 : i32
    %c0_i32_0 = arith.constant 0 : i32
    %c0_i32_1 = arith.constant 0 : i32
    return %c0_i32, %c0_i32_0 : i32, i32
  }
  func.func @transform_3(%arg0: i32) -> (i32, i32) {
    %c0_i32 = arith.constant 0 : i32
    %c0_i32_0 = arith.constant 0 : i32
    %c0_i32_1 = arith.constant 0 : i32
    return %c0_i32, %c0_i32_0 : i32, i32
  }
  func.func @transform_4(%arg0: i32) -> (i32, i32) {
    %c0_i32 = arith.constant 0 : i32
    %c0_i32_0 = arith.constant 0 : i32
    %c0_i32_1 = arith.constant 0 : i32
    return %c0_i32, %c0_i32_0 : i32, i32
  }
  func.func @transform_5(%arg0: i32) -> (i32, i32) {
    %c0_i32 = arith.constant 0 : i32
    %c0_i32_0 = arith.constant 0 : i32
    return %arg0, %c0_i32 : i32, i32
  }
}

</mosaic_0001>

<bundles_post_ra>
// kernel: tpu_custom_call.1
= control target key start
LH: loop header
LB: loop body
LE: loop exit
PB: predicated region body
PF: predicated region fallthrough
CT: control target
= control target key end

     0   :  { %s1052_s18 = smov 0   ;;  %s1169_s0 = inlined_call_operand.vmem [shape: bf16[256,32], index: 0, kind: input, shape index: {}]   ;;  %s1170_s1 = inlined_call_operand.vmem [shape: bf16[32,128], index: 1, kind: input, shape index: {}]   ;;  %s1171_s2 = inlined_call_operand.vmem [shape: f32[1,128], index: 2, kind: input, shape index: {}]   ;;  %s1172_s3 = inlined_call_operand.vmem [shape: bf16[128,8], index: 3, kind: input, shape index: {}]   ;;  %s1173_s4 = inlined_call_operand.vmem [shape: f32[1,8], index: 4, kind: input, shape index: {}]   ;;  %s1174_s5 = inlined_call_operand.vmem [shape: f32[256,8], index: 5, kind: output, shape index: {}]  }
   0x1 LB: > { %s775_s19 = sadd.s32 4294967295, %s1020_s18   ;;  %p779_p0 = scmp.ge.s32.totalorder %s1020_s18, 1  ;;  %s1020_s18 = sphi %s1052_s18, %s15_s18  }
   0x2   : > { %p188_p1 = scmp.lt.s32.totalorder %s1020_s18, 3 }
   0x4   : > { %p189_p2 = pnand %p779_p0, %p188_p1 }
   0x5   : > { %s780_s22 = sshll.u32 (!%p189_p2), %s775_s19, 4 }
   0x6   : > { %192 = sbr.rel (%p189_p2) target bundleno = 483 (0x1e3), region = 40  ;;  %p217_p3 = scmp.lt.s32.totalorder (!%p189_p2), %s780_s22, 31 }
   0xb   : > { %v932_v0 = vld [vmem:[%s1170_s1 + $0x8] sm:$0xff]   ;;  %v933_v1 = vld [vmem:[%s1170_s1] sm:$0xff]   ;;  %s1176_s22 = smov (!%p217_p3, %s780_s22), 31  ;;  %vm308_vm0 = vcmask 261120   ;;  %v942_v10 = vld [vmem:[%s1172_s3 + $0x38] sm:$0xff]   ;;  %vm702_vm1 = vcmask 64512  }
   0xc   : > { %856 = vmatprep.subr.bf16.mxu0 %v932_v0  ;;  %s781_s25 = sshll.u32 %s1176_s22, 2  ;;  %908 = vmatprep.subr.bf16.mxu1 %v942_v10  ;;  %v943_v11 = vld [vmem:[%s1172_s3 + $0x30] sm:$0xff]   ;;  %v944_v12 = vld [vmem:[%s1172_s3 + $0x28] sm:$0xff]   ;;  %v945_v13 = vld [vmem:[%s1172_s3 + $0x20] sm:$0xff]   ;;  %s783_s24 = sshll.u32 %s1176_s22, 3 }
   0xd   : > { %857 = vmatpush3.bf16.msra.mxu0 %v932_v0  ;;  %s220_s28 = scalar_lea.vmem %s1169_s0, %s781_s25  ;;  %916 = vmatpush3.bf16.msra.mxu1 %v942_v10  ;;  %v946_v14 = vld [vmem:[%s1172_s3 + $0x18] sm:$0xff]   ;;  %v947_v15 = vld [vmem:[%s1172_s3 + $0x10] sm:$0xff]   ;;  %v948_v16 = vld [vmem:[%s1172_s3 + $0x8] sm:$0xff]   ;;  %s1132_s29 = scalar_lea.vmem %s1174_s5, %s783_s24 }
   0xe   : > { %858 = vmatprep.subr.bf16.mxu0 %v933_v1  ;;  %v934_v2 = vld [vmem:[%s220_s28] sm:$0xff]   ;;  %v935_v3 = vld [vmem:[%s220_s28 + $0x8] sm:$0xff]   ;;  %v936_v4 = vld [vmem:[%s220_s28 + $0x10] sm:$0xff]   ;;  %909 = vmatprep.subr.bf16.mxu1 %v943_v11 }
   0xf   : > { %860 = vmatprep.mubr.msk.bf16.mxu0 %vm308_vm0, %v934_v2  ;;  %v937_v5 = vld [vmem:[%s220_s28 + $0x18] sm:$0xff]   ;;  %v938_v6 = vld [vmem:[%s220_s28 + $0x20] sm:$0xff]   ;;  %v939_v7 = vld [vmem:[%s220_s28 + $0x28] sm:$0xff]  }
  0x10   : > { %v940_v8 = vld [vmem:[%s220_s28 + $0x30] sm:$0xff]   ;;  %v941_v9 = vld [vmem:[%s220_s28 + $0x38] sm:$0xff]   ;;  %v949_v17 = vld [vmem:[%s1172_s3] sm:$0xff]  }
  0x11   : > { %859 = vmatpush3.bf16.msra.mxu0 %v933_v1  ;;  %917 = vmatpush3.bf16.msra.mxu1 %v943_v11  ;;  %v1107_v18 = vld [vmem:[%s1171_s2] ss:$0 sm:$0xff] }
  0x12   : > { %876 = vmatprep.subr.bf16.mxu0 %v942_v10  ;;  %910 = vmatprep.subr.bf16.mxu1 %v944_v12 }
  0x14   : > { %861 = vmatmul.mubr.msk.bf16.vlgmr.msra.gmra.mxu0 %vm308_vm0, %v935_v3 }
  0x15   : > { %864 = vmatprep.mubr.msk.bf16.mxu0 %vm308_vm0, %v936_v4  ;;  %877 = vmatpush3.bf16.msra.mxu0 %v942_v10 }
  0x16   : > { %878 = vmatprep.subr.bf16.mxu0 %v943_v11  ;;  %918 = vmatpush3.bf16.msra.mxu1 %v944_v12 }
  0x17   : > { %911 = vmatprep.subr.bf16.mxu1 %v945_v13 }
  0x19   : > { %879 = vmatpush3.bf16.msra.mxu0 %v943_v11 }
  0x1a   : > { %880 = vmatprep.subr.bf16.mxu0 %v944_v12  ;;  %919 = vmatpush3.bf16.msra.mxu1 %v945_v13 }
  0x1b   : > { %912 = vmatprep.subr.bf16.mxu1 %v946_v14 }
  0x1c   : > { %865 = vmatmul.mubr.msk.bf16.gmra.mxu0 %vm308_vm0, %v937_v5 }
  0x1d   : > { %868 = vmatprep.mubr.msk.bf16.mxu0 %vm308_vm0, %v938_v6  ;;  %881 = vmatpush3.bf16.msra.mxu0 %v944_v12 }
  0x1e   : > { %882 = vmatprep.subr.bf16.mxu0 %v945_v13  ;;  %920 = vmatpush3.bf16.msra.mxu1 %v946_v14 }
  0x1f   : > { %913 = vmatprep.subr.bf16.mxu1 %v947_v15 }
  0x21   : > { %883 = vmatpush3.bf16.msra.mxu0 %v945_v13 }
  0x22   : > { %884 = vmatprep.subr.bf16.mxu0 %v946_v14  ;;  %921 = vmatpush3.bf16.msra.mxu1 %v947_v15 }
  0x23   : > { %914 = vmatprep.subr.bf16.mxu1 %v948_v16 }
  0x24   : > { %869 = vmatmul.mubr.msk.bf16.gmra.mxu0 %vm308_vm0, %v939_v7 }
  0x25   : > { %872 = vmatprep.mubr.msk.bf16.mxu0 %vm308_vm0, %v940_v8  ;;  %885 = vmatpush3.bf16.msra.mxu0 %v946_v14 }
  0x26   : > { %886 = vmatprep.subr.bf16.mxu0 %v947_v15  ;;  %922 = vmatpush3.bf16.msra.mxu1 %v948_v16 }
  0x27   : > { %915 = vmatprep.subr.bf16.mxu1 %v949_v17 }
  0x29   : > { %887 = vmatpush3.bf16.msra.mxu0 %v947_v15 }
  0x2a   : > { %888 = vmatprep.subr.bf16.mxu0 %v948_v16  ;;  %923 = vmatpush3.bf16.msra.mxu1 %v949_v17 }
  0x2c   : > { %873 = vmatmul.mubr.msk.bf16.gmra.mxu0 %vm308_vm0, %v941_v9 }
  0x2d   : > { %889 = vmatpush3.bf16.msra.mxu0 %v948_v16 }
  0x2e   : > { %890 = vmatprep.subr.bf16.mxu0 %v949_v17 }
  0x31   : > { %891 = vmatpush3.bf16.msra.mxu0 %v949_v17 }
  0xd4   : > { %v862_v19 = vpop.f32.mrf.mxu0 }
  0xd5   : > { %v376_v20 = vadd.f32 %v862_v19, %v1107_v18 }
  0xd6   : > { %v367_v21 = vpop.f32.mrf.mxu0 }
  0xd7   : > { %v805_v22 = vmul.f32 -1.442695, %v376_v20  ;;  %v368_v23 = vadd.f32 %v1107_v18, %v367_v21 }
  0xd8   : > { %v863_v24 = vpop.f32.mrf.mxu0 }
  0xd9   : > { %950 = vpow2.f32 %v805_v22  ;;  %v803_v25 = vmul.f32 -1.442695, %v368_v23  ;;  %v379_v26 = vadd.f32 %v863_v24, %v1107_v18 }
  0xda   : > { %v370_v27 = vpop.f32.mrf.mxu0 }
  0xdb   : > { %952 = vpow2.f32 %v803_v25  ;;  %v806_v28 = vmul.f32 -1.442695, %v379_v26  ;;  %v371_v29 = vadd.f32 %v1107_v18, %v370_v27 }
  0xdc   : > { %v866_v30 = vpop.f32.mrf.mxu0 }
  0xdd   : > { %954 = vpow2.f32 %v806_v28  ;;  %v804_v31 = vmul.f32 -1.442695, %v371_v29  ;;  %v392_v32 = vadd.f32 %v866_v30, %v1107_v18 }
  0xde   : > { %v383_v33 = vpop.f32.mrf.mxu0 }
  0xdf   : > { %956 = vpow2.f32 %v804_v31  ;;  %v809_v34 = vmul.f32 -1.442695, %v392_v32  ;;  %v384_v35 = vadd.f32 %v1107_v18, %v383_v33 }
  0xe0   : > { %v867_v36 = vpop.f32.mrf.mxu0 }
  0xe1   : > { %958 = vpow2.f32 %v809_v34  ;;  %v807_v37 = vmul.f32 -1.442695, %v384_v35  ;;  %v395_v38 = vadd.f32 %v867_v36, %v1107_v18 }
  0xe2   : > { %v386_v39 = vpop.f32.mrf.mxu0 }
  0xe3   : > { %960 = vpow2.f32 %v807_v37  ;;  %v810_v40 = vmul.f32 -1.442695, %v395_v38  ;;  %v387_v41 = vadd.f32 %v1107_v18, %v386_v39 }
  0xe4   : > { %v870_v42 = vpop.f32.mrf.mxu0 }
  0xe5   : > { %962 = vpow2.f32 %v810_v40  ;;  %v808_v43 = vmul.f32 -1.442695, %v387_v41  ;;  %v408_v44 = vadd.f32 %v870_v42, %v1107_v18 }
  0xe6   : > { %v951_v45 = vpop.eup %950  ;;  %v399_v46 = vpop.f32.mrf.mxu0 }
  0xe7   : > { %v480_v47 = vadd.f32 1.0, %v951_v45  ;;  %964 = vpow2.f32 %v808_v43  ;;  %v813_v48 = vmul.f32 -1.442695, %v408_v44  ;;  %v400_v49 = vadd.f32 %v1107_v18, %v399_v46 }
  0xe8   : > { %v953_v50 = vpop.eup %952  ;;  %v871_v51 = vpop.f32.mrf.mxu0 }
  0xe9   : > { %966 = vrcp.f32 %v480_v47  ;;  %v478_v52 = vadd.f32 1.0, %v953_v50  ;;  %v811_v53 = vmul.f32 -1.442695, %v400_v49  ;;  %v411_v54 = vadd.f32 %v871_v51, %v1107_v18 }
  0xea   : > { %v955_v55 = vpop.eup %954  ;;  %968 = vpow2.f32 %v813_v48  ;;  %v402_v56 = vpop.f32.mrf.mxu0 }
  0xeb   : > { %970 = vrcp.f32 %v478_v52  ;;  %v481_v57 = vadd.f32 1.0, %v955_v55  ;;  %v814_v58 = vmul.f32 -1.442695, %v411_v54  ;;  %v403_v59 = vadd.f32 %v1107_v18, %v402_v56 }
  0xec   : > { %v957_v60 = vpop.eup %956  ;;  %972 = vpow2.f32 %v811_v53  ;;  %v874_v61 = vpop.f32.mrf.mxu0 }
  0xed   : > { %974 = vrcp.f32 %v481_v57  ;;  %v479_v62 = vadd.f32 1.0, %v957_v60  ;;  %v812_v63 = vmul.f32 -1.442695, %v403_v59  ;;  %v424_v0 = vadd.f32 %v874_v61, %v1107_v18  ;;  %v819_v59 = vld [vmem:[%s1173_s4] ss:$0 sm:$0xff] }
  0xee   : > { %v959_v1 = vpop.eup %958  ;;  %976 = vpow2.f32 %v814_v58  ;;  %v415_v2 = vpop.f32.mrf.mxu0 }
  0xef   : > { %978 = vrcp.f32 %v479_v62  ;;  %v484_v3 = vadd.f32 1.0, %v959_v1  ;;  %v817_v4 = vmul.f32 -1.442695, %v424_v0  ;;  %v416_v5 = vadd.f32 %v1107_v18, %v415_v2 }
  0xf0   : > { %v961_v6 = vpop.eup %960  ;;  %980 = vpow2.f32 %v812_v63  ;;  %v875_v7 = vpop.f32.mrf.mxu0 }
  0xf1   : > { %982 = vrcp.f32 %v484_v3  ;;  %v482_v8 = vadd.f32 1.0, %v961_v6  ;;  %v815_v9 = vmul.f32 -1.442695, %v416_v5  ;;  %v427_v10 = vadd.f32 %v875_v7, %v1107_v18 }
  0xf2   : > { %v963_v11 = vpop.eup %962  ;;  %984 = vpow2.f32 %v817_v4  ;;  %v418_v12 = vpop.f32.mrf.mxu0 }
  0xf3   : > { %986 = vrcp.f32 %v482_v8  ;;  %v485_v13 = vadd.f32 1.0, %v963_v11  ;;  %v818_v14 = vmul.f32 -1.442695, %v427_v10  ;;  %v419_v15 = vadd.f32 %v1107_v18, %v418_v12 }
  0xf4   : > { %v965_v16 = vpop.eup %964  ;;  %988 = vpow2.f32 %v815_v9 }
  0xf5   : > { %990 = vrcp.f32 %v485_v13  ;;  %v483_v17 = vadd.f32 1.0, %v965_v16  ;;  %v816_v19 = vmul.f32 -1.442695, %v419_v15 }
  0xf6   : > { %v967_v20 = vpop.eup %966  ;;  %992 = vpow2.f32 %v818_v14 }
  0xf7   : > { %v969_v21 = vpop.eup %968  ;;  %994 = vrcp.f32 %v483_v17 }
  0xf8   : > { %v971_v22 = vpop.eup %970  ;;  %996 = vpow2.f32 %v816_v19  ;;  %v488_v30 = vadd.f32 1.0, %v969_v21 }
  0xf9   : > { %v973_v23 = vpop.eup %972 }
  0xfa   : > { %v975_v24 = vpop.eup %974  ;;  %v486_v25 = vadd.f32 1.0, %v973_v23 }
  0xfb   : > { %v977_v26 = vpop.eup %976  ;;  %v527_v33 = vpack.c.bf16 %v975_v24, %v967_v20 }
  0xfc   : > { %v979_v27 = vpop.eup %978  ;;  %v489_v28 = vadd.f32 1.0, %v977_v26  ;;  %998 = vrcp.f32 %v486_v25 }
  0xfd   : > { %v981_v29 = vpop.eup %980  ;;  %v526_v18 = vpack.c.bf16 %v979_v27, %v971_v22 }
  0xfe   : > { %v983_v31 = vpop.eup %982  ;;  %v487_v32 = vadd.f32 1.0, %v981_v29  ;;  %1000 = vrcp.f32 %v489_v28 }
  0xff   : > { %v985_v34 = vpop.eup %984  ;;  %892 = vmatprep.mubr.bf16.mxu0 %v526_v18 }
 0x100   : > { %v987_v35 = vpop.eup %986  ;;  %1002 = vrcp.f32 %v487_v32  ;;  %893 = vmatmul.mubr.bf16.vlgmr.msra.gmra.mxu0 %v527_v33  ;;  %v492_v43 = vadd.f32 1.0, %v985_v34 }
 0x101   : > { %v989_v36 = vpop.eup %988  ;;  %1004 = vrcp.f32 %v488_v30 }
 0x102   : > { %v991_v37 = vpop.eup %990  ;;  %v490_v38 = vadd.f32 1.0, %v989_v36 }
 0x103   : > { %v993_v39 = vpop.eup %992  ;;  %v529_v46 = vpack.c.bf16 %v991_v37, %v983_v31 }
 0x104   : > { %v995_v40 = vpop.eup %994  ;;  %v493_v41 = vadd.f32 1.0, %v993_v39  ;;  %1006 = vrcp.f32 %v490_v38 }
 0x105   : > { %v997_v42 = vpop.eup %996  ;;  %v528_v44 = vpack.c.bf16 %v995_v40, %v987_v35 }
 0x106   : > { %v491_v45 = vadd.f32 1.0, %v997_v42  ;;  %1008 = vrcp.f32 %v493_v41 }
 0x107   : > { %896 = vmatprep.mubr.bf16.mxu1 %v528_v44 }
 0x108   : > { %1010 = vrcp.f32 %v491_v45  ;;  %897 = vmatmul.mubr.bf16.vlgmr.msra.gmra.mxu1 %v529_v46 }
 0x109   : > { %1012 = vrcp.f32 %v492_v43  ;;  %v999_v47 = vpop.eup %998 }
 0x10b   : > { %v1001_v48 = vpop.eup %1000 }
 0x10d   : > { %v1003_v49 = vpop.eup %1002 }
 0x10e   : > { %v1005_v50 = vpop.eup %1004  ;;  %v530_v51 = vpack.c.bf16 %v1003_v49, %v999_v47 }
 0x10f   : > { %v531_v52 = vpack.c.bf16 %v1001_v48, %v1005_v50 }
 0x110   : > { %900 = vmatprep.mubr.bf16.mxu1 %v530_v51 }
 0x111   : > { %901 = vmatmul.mubr.bf16.gmra.mxu1 %v531_v52  ;;  %v1007_v53 = vpop.eup %1006 }
 0x113   : > { %v1009_v54 = vpop.eup %1008 }
 0x115   : > { %v1011_v55 = vpop.eup %1010 }
 0x116   : > { %v1013_v56 = vpop.eup %1012  ;;  %v532_v57 = vpack.c.bf16 %v1011_v55, %v1007_v53 }
 0x117   : > { %v533_v58 = vpack.c.bf16 %v1009_v54, %v1013_v56 }
 0x118   : > { %904 = vmatprep.mubr.bf16.mxu1 %v532_v57 }
 0x119   : > { %905 = vmatmul.mubr.bf16.gmra.mxu1 %v533_v58 }
 0x1c0   : > { %v894_v60 = vpop.f32.mrf.mxu0 }
 0x1c1   : > { %v648_v61 = vadd.f32 %v894_v60, %v819_v59 }
 0x1c2   : > { %v639_v62 = vpop.f32.mrf.mxu0 }
 0x1c3   : > { %705 = vst.msk [vmem:[%s1132_s29 + $0x10] sm:$0xff] %vm702_vm1, %v648_v61  ;;  %v640_v63 = vadd.f32 %v819_v59, %v639_v62 }
 0x1c4   : > { %v895_v0 = vpop.f32.mrf.mxu0 }
 0x1c5   : > { %703 = vst.msk [vmem:[%s1132_s29] sm:$0xff] %vm702_vm1, %v640_v63  ;;  %v651_v1 = vadd.f32 %v895_v0, %v819_v59 }
 0x1c6   : > { %v642_v2 = vpop.f32.mrf.mxu0 }
 0x1c7   : > { %706 = vst.msk [vmem:[%s1132_s29 + $0x18] sm:$0xff] %vm702_vm1, %v651_v1  ;;  %v643_v3 = vadd.f32 %v819_v59, %v642_v2 }
 0x1c8   : > { %v898_v4 = vpop.f32.mrf.mxu1 }
 0x1c9   : > { %704 = vst.msk [vmem:[%s1132_s29 + $0x8] sm:$0xff] %vm702_vm1, %v643_v3  ;;  %v664_v5 = vadd.f32 %v898_v4, %v819_v59 }
 0x1ca   : > { %v655_v6 = vpop.f32.mrf.mxu1 }
 0x1cb   : > { %709 = vst.msk [vmem:[%s1132_s29 + $0x30] sm:$0xff] %vm702_vm1, %v664_v5  ;;  %v656_v7 = vadd.f32 %v819_v59, %v655_v6 }
 0x1cc   : > { %v899_v8 = vpop.f32.mrf.mxu1 }
 0x1cd   : > { %707 = vst.msk [vmem:[%s1132_s29 + $0x20] sm:$0xff] %vm702_vm1, %v656_v7  ;;  %v667_v9 = vadd.f32 %v899_v8, %v819_v59 }
 0x1ce   : > { %v658_v10 = vpop.f32.mrf.mxu1 }
 0x1cf   : > { %710 = vst.msk [vmem:[%s1132_s29 + $0x38] sm:$0xff] %vm702_vm1, %v667_v9  ;;  %v659_v11 = vadd.f32 %v819_v59, %v658_v10 }
 0x1d1   : > { %708 = vst.msk [vmem:[%s1132_s29 + $0x28] sm:$0xff] %vm702_vm1, %v659_v11  ;;  %v902_v12 = vpop.f32.mrf.mxu1 }
 0x1d2   : > { %v680_v13 = vadd.f32 %v902_v12, %v819_v59 }
 0x1d3   : > { %v671_v14 = vpop.f32.mrf.mxu1 }
 0x1d4   : > { %713 = vst.msk [vmem:[%s1132_s29 + $0x50] sm:$0xff] %vm702_vm1, %v680_v13  ;;  %v672_v15 = vadd.f32 %v819_v59, %v671_v14 }
 0x1d5   : > { %v903_v16 = vpop.f32.mrf.mxu1 }
 0x1d6   : > { %711 = vst.msk [vmem:[%s1132_s29 + $0x40] sm:$0xff] %vm702_vm1, %v672_v15  ;;  %v683_v17 = vadd.f32 %v903_v16, %v819_v59 }
 0x1d7   : > { %v674_v19 = vpop.f32.mrf.mxu1 }
 0x1d8   : > { %714 = vst.msk [vmem:[%s1132_s29 + $0x58] sm:$0xff] %vm702_vm1, %v683_v17  ;;  %v675_v20 = vadd.f32 %v819_v59, %v674_v19 }
 0x1d9   : > { %v906_v21 = vpop.f32.mrf.mxu1 }
 0x1da   : > { %712 = vst.msk [vmem:[%s1132_s29 + $0x48] sm:$0xff] %vm702_vm1, %v675_v20  ;;  %v696_v22 = vadd.f32 %v906_v21, %v819_v59 }
 0x1db   : > { %v687_v23 = vpop.f32.mrf.mxu1 }
 0x1dc   : > { %717 = vst.msk [vmem:[%s1132_s29 + $0x70] sm:$0xff] %vm702_vm1, %v696_v22  ;;  %v688_v24 = vadd.f32 %v819_v59, %v687_v23 }
 0x1dd   : > { %v907_v25 = vpop.f32.mrf.mxu1 }
 0x1de   : > { %715 = vst.msk [vmem:[%s1132_s29 + $0x60] sm:$0xff] %vm702_vm1, %v688_v24  ;;  %v699_v26 = vadd.f32 %v907_v25, %v819_v59 }
 0x1df   : > { %v690_v27 = vpop.f32.mrf.mxu1 }
 0x1e0   : > { %718 = vst.msk [vmem:[%s1132_s29 + $0x78] sm:$0xff] %vm702_vm1, %v699_v26  ;;  %v691_v28 = vadd.f32 %v819_v59, %v690_v27 }
 0x1e2   : > { %716 = vst.msk [vmem:[%s1132_s29 + $0x68] sm:$0xff] %vm702_vm1, %v691_v28 }
 0x1e3 PF: > { %s15_s18 = sadd.s32 1, %s1020_s18  }
 0x1e4   : > { %p12_p4 = scmp.ge.s32.totalorder %s15_s18, 4  }
 0x1e6   :  { %14 = sbr.rel (!%p12_p4) target bundleno = 1 (0x1), region = 70 }

</bundles_post_ra>
